<compile_context>
chip_gen: v7x
topology: tpu7x:2x2x1
jax: 0.10.0
libtpu: 0.0.40
codegen_flags: <defaults>
</compile_context>

<pallas_src>
import functools

import jax
import jax.numpy as jnp
from jax import lax
from jax.experimental import pallas as pl
from jax.experimental.pallas import tpu as pltpu

_LANES = 128
_SUBLANES = 8
_MAX_BLOCK_ROWS = 4096          # 4096 x 128 x 4B = 2 MiB per f32 input block
_NUM_PARTS = 2                  # leading "parallel" axis -> both v7x TensorCores
_VMEM_LIMIT = 32 * 1024 * 1024  # inside physical VMEM on v5e/v6e/v7x


def _make_charbonnier_kernel(block_rows, rows_valid, steps, eps2, needs_mask):
    """Accumulate sum(sqrt(d^2 + eps2)) into a resident (8,128) output block."""
    row_groups = block_rows // _SUBLANES
    full_blocks = rows_valid // block_rows   # blocks containing no invalid rows

    def kernel(x_ref, y_ref, o_ref):
        c = pl.program_id(0)   # part index ("parallel": split across cores)
        i = pl.program_id(1)   # step within the part ("arbitrary": reduction)

        @pl.when(i == 0)
        def _():
            o_ref[...] = jnp.zeros_like(o_ref)

        d = x_ref[...].astype(jnp.float32) - y_ref[...].astype(jnp.float32)
        val = jnp.sqrt(d * d + eps2)   # eps2 is a Python float literal

        def _accum(v):
            # (block_rows,128) -> (row_groups,8,128) -> pure VALU adds into the
            # (8,128) resident output block; no XLU cross-lane reduce here.
            o_ref[...] += v.reshape(row_groups, _SUBLANES, _LANES).sum(axis=0)

        if needs_mask:
            g = c * steps + i   # global block index (int32; fine for n < 2^38)

            @pl.when(g < full_blocks)
            def _():            # hot path: no mask / iota work at all
                _accum(val)

            @pl.when(g >= full_blocks)
            def _():            # partial or out-of-range block: mask bad rows
                row = lax.broadcasted_iota(jnp.int32, (block_rows, _LANES), 0)
                valid = (g * block_rows + row) < rows_valid
                _accum(jnp.where(valid, val, 0.0))
        else:
            _accum(val)

    return kernel


def _row_align(dtype):
    # Sublane packing granularity by element size: f32 -> 8, bf16 -> 16, i8 -> 32.
    return {4: 8, 2: 16, 1: 32}.get(jnp.dtype(dtype).itemsize, 8)


@functools.partial(jax.jit, static_argnames=("epsilon",))
def charbonnier_loss(prediction, target, epsilon=1e-8):
    """JAX/Pallas equivalent of CharbonnierLoss.forward (returns f32 scalar)."""
    assert prediction.shape == target.shape, (prediction.shape, target.shape)
    eps2 = float(epsilon) * float(epsilon)

    n = prediction.size
    x = jnp.ravel(prediction)
    y = jnp.ravel(target)

    rows = n // _LANES                       # 128-aligned prefix rows
    row_align = max(_row_align(x.dtype), _row_align(y.dtype))

    total = jnp.float32(0.0)
    n_main = 0

    if rows >= row_align:
        n_main = rows * _LANES
        block_rows = min(_MAX_BLOCK_ROWS, (rows // row_align) * row_align)
        total_blocks = pl.cdiv(rows, block_rows)
        num_parts = min(_NUM_PARTS, total_blocks)
        steps = pl.cdiv(total_blocks, num_parts)
        needs_mask = (total_blocks * block_rows != rows) or (
            num_parts * steps != total_blocks)

        if n_main == n:
            # Free reshape (no data movement).
            x2d = x.reshape(rows, _LANES)
            y2d = y.reshape(rows, _LANES)
        else:
            # TODO(synk): when n % 128 != 0 the prefix slice still costs one
            # HBM copy; avoiding it needs a 1-D / manual-DMA kernel.
            x2d = x[:n_main].reshape(rows, _LANES)
            y2d = y[:n_main].reshape(rows, _LANES)

        if num_parts * steps == total_blocks:
            def in_index_map(c, i):
                return (c * steps + i, 0)
        else:
            last_block = total_blocks - 1

            def in_index_map(c, i):
                # Clamp overhang blocks (g >= total_blocks); they are masked
                # to zero contribution inside the kernel.
                return (jnp.minimum(c * steps + i, last_block), 0)

        kernel = _make_charbonnier_kernel(block_rows, rows, steps, eps2,
                                          needs_mask)

        in_bytes = n_main * (x.dtype.itemsize + y.dtype.itemsize)
        out_bytes = num_parts * _SUBLANES * _LANES * 4
        partial = pl.pallas_call(
            kernel,
            out_shape=jax.ShapeDtypeStruct((num_parts * _SUBLANES, _LANES),
                                           jnp.float32),
            grid_spec=pltpu.PrefetchScalarGridSpec(
                num_scalar_prefetch=0,
                grid=(num_parts, steps),
                in_specs=[
                    pl.BlockSpec((block_rows, _LANES), in_index_map),
                    pl.BlockSpec((block_rows, _LANES), in_index_map),
                ],
                out_specs=pl.BlockSpec((_SUBLANES, _LANES),
                                       lambda c, i: (c, 0)),
            ),
            compiler_params=pltpu.CompilerParams(
                dimension_semantics=("parallel", "arbitrary"),
                vmem_limit_bytes=_VMEM_LIMIT,
            ),
            cost_estimate=pl.CostEstimate(
                flops=4 * n_main,
                transcendentals=n_main,
                bytes_accessed=in_bytes + out_bytes,
            ),
        )(x2d, y2d)

        total = jnp.sum(partial)

    if n_main < n:
        # <128-element flat tail (or tiny inputs): plain JAX, negligible.
        tx = x[n_main:].astype(jnp.float32)
        ty = y[n_main:].astype(jnp.float32)
        td = tx - ty
        total = total + jnp.sum(jnp.sqrt(td * td + eps2))

    return total / jnp.float32(n)


def _charbonnier_ref(prediction, target, epsilon=1e-8):
    d = prediction.astype(jnp.float32) - target.astype(jnp.float32)
    return jnp.mean(jnp.sqrt(d * d + jnp.float32(epsilon) ** 2))


if __name__ == "__main__":
    key = jax.random.PRNGKey(0)

    cases = [
        (2, 4, 16, 16),    # aligned: no mask, no tail, single block
        (2, 3, 17, 19),    # ragged: partial-block mask + <128-elem JAX tail
        (2, 8, 192, 192),  # 4608 rows: two parts (parallel axis) + partial block
    ]
    for shape in cases:
        key, kx, ky = jax.random.split(key, 3)
        pred = jax.random.normal(kx, shape, dtype=jnp.float32)
        targ = jax.random.normal(ky, shape, dtype=jnp.float32)

        loss = jax.block_until_ready(charbonnier_loss(pred, targ))
        ref = jax.block_until_ready(_charbonnier_ref(pred, targ))
        assert jnp.allclose(loss, ref, rtol=1e-5, atol=1e-6), (shape, loss, ref)

    print("KERNEL_OK")
</pallas_src>

<mosaic_0001>
module attributes {stable_mosaic.version = 11 : i64} {
  func.func @kernel(%arg0: i32, %arg1: i32, %arg2: memref<16x128xf32, #tpu.memory_space<vmem>>, %arg3: memref<16x128xf32, #tpu.memory_space<vmem>>, %arg4: memref<8x128xf32, #tpu.memory_space<vmem>>) attributes {dimension_semantics = [#tpu.dimension_semantics<parallel>, #tpu.dimension_semantics<arbitrary>], iteration_bounds = array<i64: 1, 1>, scalar_prefetch = 0 : i64, scratch_operands = 0 : i64, tpu.core_type = #tpu.core_type<tc>, window_params = [{transform_indices = @transform_0, window_bounds = array<i64: 16, 128>}, {transform_indices = @transform_1, window_bounds = array<i64: 16, 128>}, {transform_indices = @transform_2, window_bounds = array<i64: 8, 128>}]} {
    %c0_i32 = arith.constant 0 : i32
    %0 = arith.cmpi eq, %arg1, %c0_i32 : i32
    %1 = arith.extui %0 : i1 to i32
    %c0_i32_0 = arith.constant 0 : i32
    %2 = arith.cmpi ne, %1, %c0_i32_0 : i32
    scf.if %2 {
      %cst_9 = arith.constant 0.000000e+00 : f32
      %15 = vector.broadcast %cst_9 : f32 to vector<8x128xf32>
      %c0_10 = arith.constant 0 : index
      %c0_11 = arith.constant 0 : index
      %16 = vector.load %arg4[%c0_10, %c0_11] : memref<8x128xf32, #tpu.memory_space<vmem>>, vector<8x128xf32>
      tpu.vector_store %arg4[%c0_10, %c0_11], %15 {strides = array<i32>} : memref<8x128xf32, #tpu.memory_space<vmem>>, vector<8x128xf32>,
    } else {
    }
    %c0 = arith.constant 0 : index
    %c0_1 = arith.constant 0 : index
    %3 = vector.load %arg2[%c0, %c0_1] : memref<16x128xf32, #tpu.memory_space<vmem>>, vector<16x128xf32>
    %c0_2 = arith.constant 0 : index
    %c0_3 = arith.constant 0 : index
    %4 = vector.load %arg3[%c0_2, %c0_3] : memref<16x128xf32, #tpu.memory_space<vmem>>, vector<16x128xf32>
    %5 = arith.subf %3, %4 : vector<16x128xf32>
    %6 = arith.mulf %5, %5 : vector<16x128xf32>
    %cst = arith.constant 1.000000e-16 : f32
    %7 = vector.broadcast %cst : f32 to vector<16x128xf32>
    %8 = arith.addf %6, %7 : vector<16x128xf32>
    %9 = math.sqrt %8 : vector<16x128xf32>
    %c0_4 = arith.constant 0 : index
    %c0_5 = arith.constant 0 : index
    %10 = vector.load %arg4[%c0_4, %c0_5] : memref<8x128xf32, #tpu.memory_space<vmem>>, vector<8x128xf32>
    %11 = vector.shape_cast %9 : vector<16x128xf32> to vector<2x8x128xf32>
    %cst_6 = arith.constant dense<0.000000e+00> : vector<8x128xf32>
    %12 = vector.multi_reduction <add>, %11, %cst_6 [0] : vector<2x8x128xf32> to vector<8x128xf32>
    %13 = arith.addf %10, %12 : vector<8x128xf32>
    %c0_7 = arith.constant 0 : index
    %c0_8 = arith.constant 0 : index
    %14 = vector.load %arg4[%c0_7, %c0_8] : memref<8x128xf32, #tpu.memory_space<vmem>>, vector<8x128xf32>
    tpu.vector_store %arg4[%c0_7, %c0_8], %13 {strides = array<i32>} : memref<8x128xf32, #tpu.memory_space<vmem>>, vector<8x128xf32>,
    return
  }
  func.func @transform_0(%arg0: i32, %arg1: i32) -> (i32, i32) {
    %c1_i32 = arith.constant 1 : i32
    %0 = arith.muli %arg0, %c1_i32 : i32
    %1 = arith.addi %0, %arg1 : i32
    %c0_i32 = arith.constant 0 : i32
    %c0_i32_0 = arith.constant 0 : i32
    return %1, %c0_i32 : i32, i32
  }
  func.func @transform_1(%arg0: i32, %arg1: i32) -> (i32, i32) {
    %c1_i32 = arith.constant 1 : i32
    %0 = arith.muli %arg0, %c1_i32 : i32
    %1 = arith.addi %0, %arg1 : i32
    %c0_i32 = arith.constant 0 : i32
    %c0_i32_0 = arith.constant 0 : i32
    return %1, %c0_i32 : i32, i32
  }
  func.func @transform_2(%arg0: i32, %arg1: i32) -> (i32, i32) {
    %c0_i32 = arith.constant 0 : i32
    %c0_i32_0 = arith.constant 0 : i32
    return %arg0, %c0_i32 : i32, i32
  }
}

</mosaic_0001>

<bundles_post_ra>
// kernel: charbonnier_loss.1
= control target key start
LH: loop header
LB: loop body
LE: loop exit
PB: predicated region body
PF: predicated region fallthrough
CT: control target
= control target key end

     0   :  { %s139_s0 = inlined_call_operand.vmem [shape: f32[16,128], index: 0, kind: input, shape index: {}]   ;;  %s140_s1 = inlined_call_operand.vmem [shape: f32[16,128], index: 1, kind: input, shape index: {}]   ;;  %s141_s2 = inlined_call_operand.vmem [shape: f32[8,128], index: 2, kind: output, shape index: {}]  }
   0x1   :  { %v60_v0 = vld [vmem:[%s139_s0] sm:$0xff]  ;;  %v61_v1 = vld [vmem:[%s139_s0 + $0x8] sm:$0xff] }
   0x2   :  { %v62_v2 = vld [vmem:[%s140_s1] sm:$0xff]  ;;  %v63_v3 = vld [vmem:[%s140_s1 + $0x8] sm:$0xff] }
   0x3   :  { %v64_v4 = vsub.f32 %v60_v0, %v62_v2  ;;  %v65_v5 = vsub.f32 %v61_v1, %v63_v3 }
   0x5   :  { %v66_v6 = vmul.f32 %v64_v4, %v64_v4  ;;  %v67_v7 = vmul.f32 %v65_v5, %v65_v5 }
   0x7   :  { %v68_v8 = vadd.f32 1e-16, %v66_v6  ;;  %v69_v9 = vadd.f32 1e-16, %v67_v7 }
   0x9   :  { %105 = vrsqrt.f32 %v68_v8  ;;  %vm72_vm0 = vcmp.eq.f32.partialorder %v68_v8, inf  ;;  %v75_v11 = vand.u32 2147483648, %v68_v8  ;;  %vm74_vm1 = vcmp.eq.f32.partialorder %v68_v8, 0.0 }
   0xa   :  { %107 = vrsqrt.f32 %v69_v9  ;;  %vm79_vm2 = vcmp.eq.f32.partialorder %v69_v9, inf  ;;  %v82_v14 = vand.u32 2147483648, %v69_v9  ;;  %vm81_vm3 = vcmp.eq.f32.partialorder %v69_v9, 0.0 }
  0x13   :  { %v106_v10 = vpop.eup %105 }
  0x14   :  { %v108_v12 = vpop.eup %107  ;;  %v71_v13 = vmul.f32 %v106_v10, %v68_v8 }
  0x15   :  { %v78_v15 = vmul.f32 %v108_v12, %v69_v9 }
  0x16   :  { %v73_v16 = vsel %vm72_vm0, %v68_v8, %v71_v13 }
  0x17   :  { %v76_v17 = vsel %vm74_vm1, %v75_v11, %v73_v16  ;;  %v80_v18 = vsel %vm79_vm2, %v69_v9, %v78_v15 }
  0x18   :  { %v83_v19 = vsel %vm81_vm3, %v82_v14, %v80_v18 }
  0x19   :  { %v85_v20 = vadd.f32 %v83_v19, %v76_v17 }
  0x1b   :  { %87 = vst [vmem:[%s141_s2] sm:$0xff] %v85_v20 }

</bundles_post_ra>
